<compile_context>
chip_gen: v7x
topology: tpu7x:2x2x1
jax: 0.10.0
libtpu: 0.0.40
codegen_flags: <defaults>
</compile_context>

<pallas_src>
import jax
import jax.numpy as jnp
from jax.experimental import pallas as pl
from jax.experimental.pallas import tpu as pltpu


_LANE = 128
_SUBLANE = 8
_PLAN_VMEM_BUDGET = 40 << 20   # plan resident buffers to ~40 MiB (fits v7x's 64 MiB physical)


def _round_up(x, m):
    return ((x + m - 1) // m) * m


def _linear_kernel(x_ref, w_ref, b_ref, o_ref, acc_ref):
    # x_ref: (tm, tk) bf16 | w_ref: (L_pad, tk) bf16 | b_ref: (1, L_pad) f32
    # o_ref: (tm, L_pad) f32 | acc_ref: (tm, L_pad) f32 scratch (lives across K axis)
    k = pl.program_id(1)

    @pl.when(k == 0)
    def _():
        acc_ref[...] = jnp.zeros_like(acc_ref)

    # x @ W^T: contract last dims of both operands on the MXU, f32 accumulate.
    acc_ref[...] += jax.lax.dot_general(
        x_ref[...], w_ref[...],
        dimension_numbers=(((1,), (1,)), ((), ())),
        preferred_element_type=jnp.float32,
    )

    @pl.when(k == pl.num_programs(1) - 1)
    def _():
        o_ref[...] = (acc_ref[...] + b_ref[...]).astype(o_ref.dtype)


def _footprint_bytes(tm, tk, L_pad, itemsize):
    """Resident VMEM estimate: double-buffered x/W/out + accumulator + bias."""
    tm8 = _round_up(tm, _SUBLANE)
    return (2 * tm8 * tk * itemsize          # x, double buffered
            + 2 * L_pad * tk * itemsize      # W (conservatively assume 2 buffers)
            + 2 * tm8 * L_pad * 4            # out, double buffered (f32)
            + tm8 * L_pad * 4                # accumulator scratch (f32)
            + 2 * _SUBLANE * L_pad * 4)      # bias (f32, sublane padded)


def _choose_tm(B, cap):
    """Batch tile: tiny batches => one full-batch block (no padding); otherwise
    the largest candidate with <= ~5% tail padding, preferring >= 2 grid steps
    so both of v7x's TensorCores get a share (harmless on v5e/v6e)."""
    cap = max(_SUBLANE, cap)
    if B < 16 and B <= cap:
        return B
    max_pad = max(B // 20, _SUBLANE - 1)
    best = None
    for c in (1024, 512, 384, 256, 128, 64, 32, 16, 8):
        if c > cap:
            continue
        pad = (-B) % c
        if pad > max_pad:
            continue
        if (B + pad) // c >= 2:
            return c
        if best is None:
            best = c
    return best if best is not None else min(cap, 128)


def _choose_tk(D, tm, L_pad, itemsize, budget):
    """Contraction tile: full D when resident footprint fits; otherwise the
    largest multiple of 128 (<= 2048) dividing D, streamed on a K grid axis."""
    if D % _LANE != 0 or _footprint_bytes(tm, D, L_pad, itemsize) <= budget:
        return D
    nlanes = D // _LANE
    for m in range(min(nlanes, 2048 // _LANE), 0, -1):
        if nlanes % m == 0 and _footprint_bytes(tm, m * _LANE, L_pad, itemsize) <= budget:
            return m * _LANE
    return _LANE


def _pallas_linear(x2d, weight, b2d, *, tm, tk, L_pad, nk, vmem_limit,
                   single_buffer_resident):
    B_pad, D = x2d.shape
    nb = B_pad // tm

    resident_kwargs = (
        dict(pipeline_mode=pl.Buffered(1)) if single_buffer_resident else {}
    )
    # W is re-fetched per K step when the feature axis is tiled -> keep default
    # double buffering in that case; single-buffer it only when fully resident.
    w_kwargs = resident_kwargs if nk == 1 else {}

    cost = pl.CostEstimate(
        flops=2 * B_pad * D * L_pad,
        transcendentals=0,
        bytes_accessed=(x2d.dtype.itemsize * (B_pad * D + L_pad * D)
                        + 4 * (B_pad * L_pad + L_pad)),
    )

    return pl.pallas_call(
        _linear_kernel,
        out_shape=jax.ShapeDtypeStruct((B_pad, L_pad), jnp.float32),
        grid_spec=pltpu.PrefetchScalarGridSpec(
            num_scalar_prefetch=0,
            grid=(nb, nk),
            in_specs=[
                # x: one (tm, tk) tile per grid step, streamed/pipelined.
                pl.BlockSpec((tm, tk), lambda i, k: (i, k)),
                # W: moves only along K; constant when nk == 1 (VMEM resident).
                pl.BlockSpec((L_pad, tk), lambda i, k: (0, k), **w_kwargs),
                # bias: tiny, always resident.
                pl.BlockSpec((1, L_pad), lambda i, k: (0, 0), **resident_kwargs),
            ],
            out_specs=pl.BlockSpec((tm, L_pad), lambda i, k: (i, 0)),
            scratch_shapes=[pltpu.VMEM((tm, L_pad), jnp.float32)],
        ),
        compiler_params=pltpu.CompilerParams(
            dimension_semantics=("parallel", "arbitrary"),
            vmem_limit_bytes=vmem_limit,
        ),
        cost_estimate=cost,
    )(x2d, weight, b2d)


def linear_classifier_forward(x_nchw, weight, bias, *, compute_dtype=jnp.bfloat16):
    """Pallas equivalent of LinearClassifier.forward.

    x_nchw : (B, C, H, W) float32 (any trailing shape; flattened to (B, D))
    weight : (L, D)       float32 (PyTorch nn.Linear convention)
    bias   : (L,)         float32
    returns: (B, L)       float32
    """
    B = x_nchw.shape[0]
    x2d = x_nchw.reshape(B, -1)           # x.view(x.size(0), -1)
    D = x2d.shape[1]
    L = weight.shape[0]
    L_pad = _round_up(L, _LANE)           # lane-dense output width (unmasked stores)

    # bf16 streaming of the two large operands; f32 accumulation in the kernel.
    # (In a real pipeline the frozen backbone emits bf16 features / XLA fuses
    #  this cast into the producer, so the kernel streams half the bytes.)
    cdt = jnp.dtype(compute_dtype)
    itemsize = cdt.itemsize
    x2d = x2d.astype(cdt)
    weight_c = weight.astype(cdt)

    if L_pad != L:                        # tiny, weight/bias only
        weight_c = jnp.pad(weight_c, ((0, L_pad - L), (0, 0)))
        bias = jnp.pad(bias, (0, L_pad - L))
    b2d = bias.astype(jnp.float32).reshape(1, L_pad)

    # ---- tile selection (VMEM-budgeted) ------------------------------------
    tk_nominal = D if D % _LANE else min(D, 2048)
    cap = 1024
    while cap > _SUBLANE and 2 * cap * tk_nominal * itemsize > _PLAN_VMEM_BUDGET // 2:
        cap //= 2
    tm = _choose_tm(B, cap)
    tk = _choose_tk(D, tm, L_pad, itemsize, _PLAN_VMEM_BUDGET)
    while tm > _SUBLANE and _footprint_bytes(tm, tk, L_pad, itemsize) > _PLAN_VMEM_BUDGET:
        tm = max(_SUBLANE, (tm // 2) // _SUBLANE * _SUBLANE)

    B_pad = _round_up(B, tm)
    if B_pad != B:                        # bounded tail pad; skipped when divisible
        x2d = jnp.pad(x2d, ((0, B_pad - B), (0, 0)))
    nk = D // tk

    vmem_limit = int(min(64 << 20,
                         max(16 << 20,
                             _footprint_bytes(tm, tk, L_pad, itemsize) * 3 // 2
                             + (4 << 20))))

    kw = dict(tm=tm, tk=tk, L_pad=L_pad, nk=nk, vmem_limit=vmem_limit)
    try:
        out = _pallas_linear(x2d, weight_c, b2d, single_buffer_resident=True, **kw)
    except Exception:
        # pl.Buffered(1) on the resident W/bias blocks is only a VMEM-headroom
        # hint; fall back cleanly if this jax/Mosaic build rejects pipeline_mode.
        out = _pallas_linear(x2d, weight_c, b2d, single_buffer_resident=False, **kw)

    return out[:B, :L]


def init_linear_classifier_params(key, dim, num_labels):
    """Matches LinearClassifier.__init__: weight ~ N(0, 0.01), bias = 0."""
    (wkey,) = jax.random.split(key, 1)
    weight = 0.01 * jax.random.normal(wkey, (num_labels, dim), dtype=jnp.float32)
    bias = jnp.zeros((num_labels,), dtype=jnp.float32)
    return weight, bias


if __name__ == "__main__":
    key = jax.random.PRNGKey(0)
    kx, kp = jax.random.split(key)

    # Small example consistent with the module: frozen features (B, C, H, W)
    # flattened to dim = C*H*W, 8-class head ("8cls").
    B, C, H, W = 2, 4, 16, 16
    dim = C * H * W          # 1024
    num_labels = 8

    x = jax.random.normal(kx, (B, C, H, W), dtype=jnp.float32)
    weight, bias = init_linear_classifier_params(kp, dim, num_labels)

    y = linear_classifier_forward(x, weight, bias)
    y = jax.block_until_ready(y)
    assert y.shape == (B, num_labels)

    # Reference with the same bf16-input / f32-accumulate numerics.
    xb = x.reshape(B, -1).astype(jnp.bfloat16).astype(jnp.float32)
    wb = weight.astype(jnp.bfloat16).astype(jnp.float32)
    y_bf16_ref = xb @ wb.T + bias
    assert jnp.allclose(y, y_bf16_ref, atol=1e-3, rtol=1e-3)

    # Loose check against the full-f32 nn.Linear reference (bf16 input rounding).
    y_f32_ref = x.reshape(B, -1) @ weight.T + bias
    assert jnp.allclose(y, y_f32_ref, atol=5e-2, rtol=5e-2)

    print("KERNEL_OK")
</pallas_src>

<mosaic_0001>
module attributes {stable_mosaic.version = 11 : i64} {
  func.func @_linear_kernel(%arg0: i32, %arg1: i32, %arg2: memref<2x1024xbf16, #tpu.memory_space<vmem>>, %arg3: memref<128x1024xbf16, #tpu.memory_space<vmem>>, %arg4: memref<1x128xf32, #tpu.memory_space<vmem>>, %arg5: memref<2x128xf32, #tpu.memory_space<vmem>>, %arg6: memref<2x128xf32, #tpu.memory_space<vmem>>) attributes {dimension_semantics = [#tpu.dimension_semantics<parallel>, #tpu.dimension_semantics<arbitrary>], iteration_bounds = array<i64: 1, 1>, scalar_prefetch = 0 : i64, scratch_operands = 1 : i64, tpu.core_type = #tpu.core_type<tc>, window_params = [{transform_indices = @transform_0, window_bounds = array<i64: 2, 1024>}, {pipeline_mode = #tpu.pipeline_mode<synchronous>, transform_indices = @transform_1, window_bounds = array<i64: 128, 1024>}, {pipeline_mode = #tpu.pipeline_mode<synchronous>, transform_indices = @transform_2, window_bounds = array<i64: 1, 128>}, {transform_indices = @transform_3, window_bounds = array<i64: 2, 128>}]} {
    %c0_i32 = arith.constant 0 : i32
    %0 = arith.cmpi eq, %arg1, %c0_i32 : i32
    %1 = arith.extui %0 : i1 to i32
    %c0_i32_0 = arith.constant 0 : i32
    %2 = arith.cmpi ne, %1, %c0_i32_0 : i32
    scf.if %2 {
      %cst_10 = arith.constant 0.000000e+00 : f32
      %12 = vector.broadcast %cst_10 : f32 to vector<2x128xf32>
      %c0_11 = arith.constant 0 : index
      %c0_12 = arith.constant 0 : index
      %13 = vector.load %arg6[%c0_11, %c0_12] : memref<2x128xf32, #tpu.memory_space<vmem>>, vector<2x128xf32>
      tpu.vector_store %arg6[%c0_11, %c0_12], %12 {strides = array<i32>} : memref<2x128xf32, #tpu.memory_space<vmem>>, vector<2x128xf32>,
    } else {
    }
    %c0 = arith.constant 0 : index
    %c0_1 = arith.constant 0 : index
    %3 = vector.load %arg6[%c0, %c0_1] : memref<2x128xf32, #tpu.memory_space<vmem>>, vector<2x128xf32>
    %c0_2 = arith.constant 0 : index
    %c0_3 = arith.constant 0 : index
    %4 = vector.load %arg2[%c0_2, %c0_3] : memref<2x1024xbf16, #tpu.memory_space<vmem>>, vector<2x1024xbf16>
    %c0_4 = arith.constant 0 : index
    %c0_5 = arith.constant 0 : index
    %5 = vector.load %arg3[%c0_4, %c0_5] : memref<128x1024xbf16, #tpu.memory_space<vmem>>, vector<128x1024xbf16>
    %cst = arith.constant dense<0.000000e+00> : vector<2x128xf32>
    %6 = tpu.matmul %4, %5, %cst {dimension_numbers = #tpu.dot_dimension_numbers<[1], [1], [0], [0], [0, 0, 1, 0], [], []>} : vector<2x1024xbf16>, vector<128x1024xbf16>, vector<2x128xf32> -> vector<2x128xf32>
    %7 = arith.addf %3, %6 : vector<2x128xf32>
    %c0_6 = arith.constant 0 : index
    %c0_7 = arith.constant 0 : index
    %8 = vector.load %arg6[%c0_6, %c0_7] : memref<2x128xf32, #tpu.memory_space<vmem>>, vector<2x128xf32>
    tpu.vector_store %arg6[%c0_6, %c0_7], %7 {strides = array<i32>} : memref<2x128xf32, #tpu.memory_space<vmem>>, vector<2x128xf32>,
    %c0_i32_8 = arith.constant 0 : i32
    %9 = arith.cmpi eq, %arg1, %c0_i32_8 : i32
    %10 = arith.extui %9 : i1 to i32
    %c0_i32_9 = arith.constant 0 : i32
    %11 = arith.cmpi ne, %10, %c0_i32_9 : i32
    scf.if %11 {
      %c0_10 = arith.constant 0 : index
      %c0_11 = arith.constant 0 : index
      %12 = vector.load %arg6[%c0_10, %c0_11] : memref<2x128xf32, #tpu.memory_space<vmem>>, vector<2x128xf32>
      %c0_12 = arith.constant 0 : index
      %c0_13 = arith.constant 0 : index
      %13 = vector.load %arg4[%c0_12, %c0_13] : memref<1x128xf32, #tpu.memory_space<vmem>>, vector<1x128xf32>
      %14 = vector.broadcast %13 : vector<1x128xf32> to vector<2x128xf32>
      %15 = arith.addf %12, %14 : vector<2x128xf32>
      %c0_14 = arith.constant 0 : index
      %c0_15 = arith.constant 0 : index
      %16 = vector.load %arg5[%c0_14, %c0_15] : memref<2x128xf32, #tpu.memory_space<vmem>>, vector<2x128xf32>
      tpu.vector_store %arg5[%c0_14, %c0_15], %15 {strides = array<i32>} : memref<2x128xf32, #tpu.memory_space<vmem>>, vector<2x128xf32>,
    } else {
    }
    return
  }
  func.func @transform_0(%arg0: i32, %arg1: i32) -> (i32, i32) {
    %c0_i32 = arith.constant 0 : i32
    return %arg0, %arg1 : i32, i32
  }
  func.func @transform_1(%arg0: i32, %arg1: i32) -> (i32, i32) {
    %c0_i32 = arith.constant 0 : i32
    %c0_i32_0 = arith.constant 0 : i32
    return %c0_i32, %arg1 : i32, i32
  }
  func.func @transform_2(%arg0: i32, %arg1: i32) -> (i32, i32) {
    %c0_i32 = arith.constant 0 : i32
    %c0_i32_0 = arith.constant 0 : i32
    %c0_i32_1 = arith.constant 0 : i32
    return %c0_i32, %c0_i32_0 : i32, i32
  }
  func.func @transform_3(%arg0: i32, %arg1: i32) -> (i32, i32) {
    %c0_i32 = arith.constant 0 : i32
    %c0_i32_0 = arith.constant 0 : i32
    return %arg0, %c0_i32 : i32, i32
  }
}

module attributes {stable_mosaic.version = 11 : i64} {
  func.func @_linear_kernel(%arg0: i32, %arg1: i32, %arg2: memref<2x1024xbf16, #tpu.memory_space<vmem>>, %arg3: memref<128x1024xbf16, #tpu.memory_space<vmem>>, %arg4: memref<1x128xf32, #tpu.memory_space<vmem>>, %arg5: memref<2x128xf32, #tpu.memory_space<vmem>>, %arg6: memref<2x128xf32, #tpu.memory_space<vmem>>) attributes {dimension_semantics = [#tpu.dimension_semantics<parallel>, #tpu.dimension_semantics<arbitrary>], iteration_bounds = array<i64: 1, 1>, scalar_prefetch = 0 : i64, scratch_operands = 1 : i64, tpu.core_type = #tpu.core_type<tc>, window_params = [{transform_indices = @transform_0, window_bounds = array<i64: 2, 1024>}, {transform_indices = @transform_1, window_bounds = array<i64: 128, 1024>}, {pipeline_mode = #tpu.pipeline_mode<synchronous>, transform_indices = @transform_2, window_bounds = array<i64: 1, 128>}, {transform_indices = @transform_3, window_bounds = array<i64: 2, 128>}]} {
    %c0_i32 = arith.constant 0 : i32
    %0 = arith.cmpi eq, %arg1, %c0_i32 : i32
    %1 = arith.extui %0 : i1 to i32
    %c0_i32_0 = arith.constant 0 : i32
    %2 = arith.cmpi ne, %1, %c0_i32_0 : i32
    scf.if %2 {
      %cst_10 = arith.constant 0.000000e+00 : f32
      %12 = vector.broadcast %cst_10 : f32 to vector<2x128xf32>
      %c0_11 = arith.constant 0 : index
      %c0_12 = arith.constant 0 : index
      %13 = vector.load %arg6[%c0_11, %c0_12] : memref<2x128xf32, #tpu.memory_space<vmem>>, vector<2x128xf32>
      tpu.vector_store %arg6[%c0_11, %c0_12], %12 {strides = array<i32>} : memref<2x128xf32, #tpu.memory_space<vmem>>, vector<2x128xf32>,
    } else {
    }
    %c0 = arith.constant 0 : index
    %c0_1 = arith.constant 0 : index
    %3 = vector.load %arg6[%c0, %c0_1] : memref<2x128xf32, #tpu.memory_space<vmem>>, vector<2x128xf32>
    %c0_2 = arith.constant 0 : index
    %c0_3 = arith.constant 0 : index
    %4 = vector.load %arg2[%c0_2, %c0_3] : memref<2x1024xbf16, #tpu.memory_space<vmem>>, vector<2x1024xbf16>
    %c0_4 = arith.constant 0 : index
    %c0_5 = arith.constant 0 : index
    %5 = vector.load %arg3[%c0_4, %c0_5] : memref<128x1024xbf16, #tpu.memory_space<vmem>>, vector<128x1024xbf16>
    %cst = arith.constant dense<0.000000e+00> : vector<2x128xf32>
    %6 = tpu.matmul %4, %5, %cst {dimension_numbers = #tpu.dot_dimension_numbers<[1], [1], [0], [0], [0, 0, 1, 0], [], []>} : vector<2x1024xbf16>, vector<128x1024xbf16>, vector<2x128xf32> -> vector<2x128xf32>
    %7 = arith.addf %3, %6 : vector<2x128xf32>
    %c0_6 = arith.constant 0 : index
    %c0_7 = arith.constant 0 : index
    %8 = vector.load %arg6[%c0_6, %c0_7] : memref<2x128xf32, #tpu.memory_space<vmem>>, vector<2x128xf32>
    tpu.vector_store %arg6[%c0_6, %c0_7], %7 {strides = array<i32>} : memref<2x128xf32, #tpu.memory_space<vmem>>, vector<2x128xf32>,
    %c0_i32_8 = arith.constant 0 : i32
    %9 = arith.cmpi eq, %arg1, %c0_i32_8 : i32
    %10 = arith.extui %9 : i1 to i32
    %c0_i32_9 = arith.constant 0 : i32
    %11 = arith.cmpi ne, %10, %c0_i32_9 : i32
    scf.if %11 {
      %c0_10 = arith.constant 0 : index
      %c0_11 = arith.constant 0 : index
      %12 = vector.load %arg6[%c0_10, %c0_11] : memref<2x128xf32, #tpu.memory_space<vmem>>, vector<2x128xf32>
      %c0_12 = arith.constant 0 : index
      %c0_13 = arith.constant 0 : index
      %13 = vector.load %arg4[%c0_12, %c0_13] : memref<1x128xf32, #tpu.memory_space<vmem>>, vector<1x128xf32>
      %14 = vector.broadcast %13 : vector<1x128xf32> to vector<2x128xf32>
      %15 = arith.addf %12, %14 : vector<2x128xf32>
      %c0_14 = arith.constant 0 : index
      %c0_15 = arith.constant 0 : index
      %16 = vector.load %arg5[%c0_14, %c0_15] : memref<2x128xf32, #tpu.memory_space<vmem>>, vector<2x128xf32>
      tpu.vector_store %arg5[%c0_14, %c0_15], %15 {strides = array<i32>} : memref<2x128xf32, #tpu.memory_space<vmem>>, vector<2x128xf32>,
    } else {
    }
    return
  }
  func.func @transform_0(%arg0: i32, %arg1: i32) -> (i32, i32) {
    %c0_i32 = arith.constant 0 : i32
    return %arg0, %arg1 : i32, i32
  }
  func.func @transform_1(%arg0: i32, %arg1: i32) -> (i32, i32) {
    %c0_i32 = arith.constant 0 : i32
    %c0_i32_0 = arith.constant 0 : i32
    return %c0_i32, %arg1 : i32, i32
  }
  func.func @transform_2(%arg0: i32, %arg1: i32) -> (i32, i32) {
    %c0_i32 = arith.constant 0 : i32
    %c0_i32_0 = arith.constant 0 : i32
    %c0_i32_1 = arith.constant 0 : i32
    return %c0_i32, %c0_i32_0 : i32, i32
  }
  func.func @transform_3(%arg0: i32, %arg1: i32) -> (i32, i32) {
    %c0_i32 = arith.constant 0 : i32
    %c0_i32_0 = arith.constant 0 : i32
    return %arg0, %c0_i32 : i32, i32
  }
}

</mosaic_0001>

<bundles_post_ra>
// kernel: tpu_custom_call.1
= control target key start
LH: loop header
LB: loop body
LE: loop exit
PB: predicated region body
PF: predicated region fallthrough
CT: control target
= control target key end

     0   :  { %8 = vsyncpa [#allocation4], 0  ;;  %s923_s0 = inlined_call_operand.hbm [shape: bf16[2,1024], index: 0, kind: input, shape index: {}]   ;;  %s924_s1 = inlined_call_operand.hbm [shape: bf16[128,1024], index: 1, kind: input, shape index: {}]   ;;  %s925_s2 = inlined_call_operand.vmem [shape: f32[1,128], index: 2, kind: input, shape index: {}]   ;;  %s926_s3 = inlined_call_operand.hbm [shape: f32[2,128], index: 3, kind: output, shape index: {}]  }
   0x1   :  { %9 = vsyncpa [#allocation7], 0 }
   0x2   :  { %10 = vsyncpa [#allocation5], 0  ;;  %s827_s12 = smov [#allocation3]   ;;  %s828_s14 = smov [#allocation6]  }
   0x3   :  { %s17_s13 = sshll.u32 %s827_s12, 4  ;;  %s26_s15 = sshll.u32 %s828_s14, 4  ;;  %s18_s13 = int_to_ptr.vmem [resolvable:$true] %s17_s13  ;;  %s854_s15 = int_to_ptr.vmem [resolvable:$true] %s26_s15 }
   0x4   :  { %s755_s18 = scalar_lea.hbm %s923_s0, 128 }
   0x5   :  { %p756_p0 = scmp.ne.s32.totalorder %s923_s0, %s755_s18  ;;  %p759_p1 = scmp.lt.u32.totalorder %s755_s18, %s923_s0 }
   0x7   :  { %p761_p2 = pnand %p759_p1, %p756_p0 }
   0x9   :  { %764 = shalt.err (!%p761_p2)
}
   0xa   :  { %s765_s23 = scalar_lea.vmem %s18_s13, 128  ;;  %p770_p4 = scmp.lt.s32.totalorder %s18_s13, %s18_s13 }
   0xb   :  { %p766_p3 = scmp.ne.s32.totalorder %s18_s13, %s765_s23  ;;  %p771_p5 = scmp.lt.s32.totalorder %s765_s23, %s765_s23 }
   0xd   :  { %p772_p6 = por %p771_p5, %p770_p4 }
   0xf   :  { %p773_p7 = pnand %p772_p6, %p766_p3 }
  0x11   :  { %776 = shalt.err (!%p773_p7)
}
  0x12   :  { %20 = dma.hbm_to_vmem [thread:$0]  %s923_s0, 128, %s18_s13, [#allocation4]  }
  0x13   :  { %s777_s28 = scalar_lea.hbm %s924_s1, 8192 }
  0x14   :  { %p778_p8 = scmp.ne.s32.totalorder %s924_s1, %s777_s28  ;;  %p781_p9 = scmp.lt.u32.totalorder %s777_s28, %s924_s1 }
  0x16   :  { %p783_p10 = pnand %p781_p9, %p778_p8 }
  0x18   :  { %786 = shalt.err (!%p783_p10)
}
  0x19   :  { %s787_s6 = scalar_lea.vmem %s854_s15, 8192  ;;  %p792_p12 = scmp.lt.s32.totalorder %s854_s15, %s854_s15 }
  0x1a   :  { %p788_p11 = scmp.ne.s32.totalorder %s854_s15, %s787_s6  ;;  %p793_p13 = scmp.lt.s32.totalorder %s787_s6, %s787_s6 }
  0x1c   :  { %p794_p0 = por %p793_p13, %p792_p12 }
  0x1e   :  { %p795_p1 = pnand %p794_p0, %p788_p11 }
  0x20   :  { %798 = shalt.err (!%p795_p1)
}
  0x21   :  { %s829_s0 = smov 512   ;;  %s830_s7 = smov 32  }
  0x22   :  { %32 = dma.hbm_to_vmem [thread:$0]  %s924_s1, 8192, %s854_s15, [#allocation7], %s829_s0, %s829_s0, %s830_s7  }
  0x23   :  { %821 = dma.done.wait [#allocation4], 128  }
  0x24   :  { %822 = vsyncadd [#allocation4], 4294967168 }
  0x25   :  { %823 = dma.done.wait [#allocation7], 8192  }
  0x26   :  { %824 = vsyncadd [#allocation7], 4294959104  ;;  %v831_v0 = vmov 1966171168   ;;  %v118_v2 = vlaneseq  ;;  %v49_v3 = vld [vmem:[#allocation6] sm:$0xff]  ;;  %v50_v5 = vld [vmem:[#allocation6 + $0x8] sm:$0xff] }
  0x27   :  { %v116_v1 = vunpack.c.l.s4 %v831_v0  ;;  %v53_v4 = vld [vmem:[#allocation6 + $0x20] sm:$0xff]  ;;  %v54_v7 = vld [vmem:[#allocation6 + $0x28] sm:$0xff]  ;;  %v48_v28 = vld [vmem:[#allocation3] sm:$0xff]  ;;  %s833_s11 = smov [#allocation8]  }
  0x28   :  { %v683_v6 = vcombine.high %v49_v3, %v53_v4  ;;  %v682_v8 = vcombine.low %v49_v3, %v53_v4  ;;  %v57_v9 = vld [vmem:[#allocation6 + $0x40] sm:$0xff]  ;;  %v685_v11 = vcombine.high %v50_v5, %v54_v7  ;;  %v684_v12 = vcombine.low %v50_v5, %v54_v7  ;;  %v58_v14 = vld [vmem:[#allocation6 + $0x48] sm:$0xff]  ;;  %s672_s12 = sshll.u32 %s833_s11, 4  ;;  %s673_s12 = int_to_ptr.vmem [resolvable:$true] %s672_s12 }
  0x29   :  { %v61_v10 = vld [vmem:[#allocation6 + $0x60] sm:$0xff]  ;;  %v62_v15 = vld [vmem:[#allocation6 + $0x68] sm:$0xff]  ;;  %v117_v17 = vunpack.c.0.s8 %v116_v1  ;;  %v119_v18 = vshrl.u32 %v118_v2, 7  ;;  %v114_v39 = vcombine.high %v48_v28, %v48_v28  ;;  %s799_s13 = scalar_lea.vmem %s673_s12, 32  ;;  %p804_p3 = scmp.lt.s32.totalorder %s673_s12, %s673_s12 }
  0x2a   :  { %v691_v13 = vcombine.high %v57_v9, %v61_v10  ;;  %491 = vmatprep.subr.bf16.mxu0 %v683_v6  ;;  %v693_v16 = vcombine.high %v58_v14, %v62_v15  ;;  %531 = vmatprep.subr.bf16.mxu1 %v685_v11  ;;  %v65_v19 = vld [vmem:[#allocation6 + $0x80] sm:$0xff]  ;;  %v66_v21 = vld [vmem:[#allocation6 + $0x88] sm:$0xff]  ;;  %v690_v24 = vcombine.low %v57_v9, %v61_v10  ;;  %p800_p2 = scmp.ne.s32.totalorder %s673_s12, %s799_s13  ;;  %p805_p4 = scmp.lt.s32.totalorder %s799_s13, %s799_s13 }
  0x2b   :  { %492 = vmatpush1.bf16.xpose.msra.mxu0 %v682_v8  ;;  %532 = vmatpush1.bf16.xpose.msra.mxu1 %v684_v12  ;;  %v69_v20 = vld [vmem:[#allocation6 + $0xa0] sm:$0xff]  ;;  %v70_v22 = vld [vmem:[#allocation6 + $0xa8] sm:$0xff]  ;;  %v885_v23 = vsub.s32 %v117_v17, %v119_v18  ;;  %v692_v25 = vcombine.low %v58_v14, %v62_v15  ;;  %v51_v12 = vld [vmem:[#allocation6 + $0x10] sm:$0xff] }
  0x2c   :  { %493 = vmatprep.subr.bf16.mxu0 %v691_v13  ;;  %533 = vmatprep.subr.bf16.mxu1 %v693_v16  ;;  %v699_v26 = vcombine.high %v65_v19, %v69_v20  ;;  %v701_v27 = vcombine.high %v66_v21, %v70_v22  ;;  %v73_v31 = vld [vmem:[#allocation6 + $0xc0] sm:$0xff]  ;;  %v74_v33 = vld [vmem:[#allocation6 + $0xc8] sm:$0xff]  ;;  %v698_v36 = vcombine.low %v65_v19, %v69_v20  ;;  %v55_v13 = vld [vmem:[#allocation6 + $0x30] sm:$0xff]  ;;  %p806_p5 = por %p805_p4, %p804_p3 }
  0x2d   :  { %v888_v29 = vrot.slane %v48_v28, %v885_v23  ;;  %v77_v32 = vld [vmem:[#allocation6 + $0xe0] sm:$0xff]  ;;  %v78_v34 = vld [vmem:[#allocation6 + $0xe8] sm:$0xff]  ;;  %v700_v37 = vcombine.low %v66_v21, %v70_v22  ;;  %v894_v42 = vrot.slane %v114_v39, %v885_v23  ;;  %v52_v14 = vld [vmem:[#allocation6 + $0x18] sm:$0xff]  ;;  %v687_v18 = vcombine.high %v51_v12, %v55_v13 }
  0x2e   :  { %v707_v38 = vcombine.high %v73_v31, %v77_v32  ;;  %v709_v41 = vcombine.high %v74_v33, %v78_v34  ;;  %v81_v43 = vld [vmem:[#allocation6 + $0x100] sm:$0xff]  ;;  %v82_v45 = vld [vmem:[#allocation6 + $0x108] sm:$0xff]  ;;  %v706_v48 = vcombine.low %v73_v31, %v77_v32  ;;  %v708_v49 = vcombine.low %v74_v33, %v78_v34  ;;  %v56_v15 = vld [vmem:[#allocation6 + $0x38] sm:$0xff]  ;;  %p807_p6 = pnand %p806_p5, %p800_p2 }
  0x2f   :  { %v129_v30 = vcombine.high %v888_v29, %v888_v29  ;;  %v85_v44 = vld [vmem:[#allocation6 + $0x120] sm:$0xff]  ;;  %v86_v46 = vld [vmem:[#allocation6 + $0x128] sm:$0xff]  ;;  %v898_v47 = vrot.slane %v894_v42, %v885_v23  ;;  %v689_v19 = vcombine.high %v52_v14, %v56_v15  ;;  %v130_v20 = vcombine.high %v894_v42, %v894_v42  ;;  %v59_v22 = vld [vmem:[#allocation6 + $0x50] sm:$0xff] }
  0x30   :  { %v715_v50 = vcombine.high %v81_v43, %v85_v44  ;;  %v717_v51 = vcombine.high %v82_v45, %v86_v46  ;;  %v89_v52 = vld [vmem:[#allocation6 + $0x140] sm:$0xff]  ;;  %v90_v54 = vld [vmem:[#allocation6 + $0x148] sm:$0xff]  ;;  %v714_v56 = vcombine.low %v81_v43, %v85_v44  ;;  %v716_v57 = vcombine.low %v82_v45, %v86_v46  ;;  %v79_v42 = vld [vmem:[#allocation6 + $0xf0] sm:$0xff] }
  0x31   :  { %v151_v35 = vrot.slane %v129_v30, %v885_v23  ;;  %v93_v53 = vld [vmem:[#allocation6 + $0x160] sm:$0xff]  ;;  %v94_v55 = vld [vmem:[#allocation6 + $0x168] sm:$0xff]  ;;  %v137_v21 = vrot.slane %v888_v29, %v885_v23  ;;  %v686_v30 = vcombine.low %v51_v12, %v55_v13  ;;  %v688_v31 = vcombine.low %v52_v14, %v56_v15  ;;  %v67_v29 = vld [vmem:[#allocation6 + $0x90] sm:$0xff] }
  0x32   :  { %v723_v58 = vcombine.high %v89_v52, %v93_v53  ;;  %v725_v59 = vcombine.high %v90_v54, %v94_v55  ;;  %v97_v60 = vld [vmem:[#allocation6 + $0x180] sm:$0xff]  ;;  %v98_v62 = vld [vmem:[#allocation6 + $0x188] sm:$0xff]  ;;  %v722_v0 = vcombine.low %v89_v52, %v93_v53  ;;  %v724_v1 = vcombine.low %v90_v54, %v94_v55  ;;  %v76_v43 = vld [vmem:[#allocation6 + $0xd8] sm:$0xff] }
  0x33   :  { %494 = vmatpush1.bf16.xpose.msra.mxu0 %v690_v24  ;;  %534 = vmatpush1.bf16.xpose.msra.mxu1 %v692_v25  ;;  %v161_v40 = vcombine.high %v151_v35, %v151_v35  ;;  %v101_v61 = vld [vmem:[#allocation6 + $0x1a0] sm:$0xff]  ;;  %v102_v63 = vld [vmem:[#allocation6 + $0x1a8] sm:$0xff]  ;;  %v63_v24 = vld [vmem:[#allocation6 + $0x70] sm:$0xff]  ;;  %v159_v28 = vcombine.high %v137_v21, %v137_v21 }
  0x34   :  { %495 = vmatprep.subr.bf16.mxu0 %v699_v26  ;;  %535 = vmatprep.subr.bf16.mxu1 %v701_v27  ;;  %v731_v2 = vcombine.high %v97_v60, %v101_v61  ;;  %v733_v3 = vcombine.high %v98_v62, %v102_v63  ;;  %v105_v4 = vld [vmem:[#allocation6 + $0x1c0] sm:$0xff]  ;;  %v106_v6 = vld [vmem:[#allocation6 + $0x1c8] sm:$0xff]  ;;  %v730_v8 = vcombine.low %v97_v60, %v101_v61  ;;  %v60_v25 = vld [vmem:[#allocation6 + $0x58] sm:$0xff] }
  0x35   :  { %523 = vmatprep.mubr.bf16.mxu0 %v151_v35  ;;  %563 = vmatprep.mubr.bf16.mxu1 %v161_v40  ;;  %v109_v5 = vld [vmem:[#allocation6 + $0x1e0] sm:$0xff]  ;;  %v110_v7 = vld [vmem:[#allocation6 + $0x1e8] sm:$0xff]  ;;  %v732_v9 = vcombine.low %v98_v62, %v102_v63  ;;  %v64_v26 = vld [vmem:[#allocation6 + $0x78] sm:$0xff]  ;;  %v158_v27 = vrot.slane %v130_v20, %v885_v23  ;;  %v695_v32 = vcombine.high %v59_v22, %v63_v24 }
  0x36   :  { %v739_v10 = vcombine.high %v105_v4, %v109_v5  ;;  %v741_v11 = vcombine.high %v106_v6, %v110_v7  ;;  %v738_v16 = vcombine.low %v105_v4, %v109_v5  ;;  %v740_v17 = vcombine.low %v106_v6, %v110_v7  ;;  %v71_v35 = vld [vmem:[#allocation6 + $0xb0] sm:$0xff]  ;;  %v80_v44 = vld [vmem:[#allocation6 + $0xf8] sm:$0xff] }
  0x37   :  { %v697_v33 = vcombine.high %v60_v25, %v64_v26  ;;  %v162_v34 = vcombine.high %v158_v27, %v158_v27  ;;  %v696_v23 = vcombine.low %v60_v25, %v64_v26  ;;  %v703_v39 = vcombine.high %v67_v29, %v71_v35  ;;  %v84_v52 = vld [vmem:[#allocation6 + $0x118] sm:$0xff] }
  0x38   :  { %v702_v45 = vcombine.low %v67_v29, %v71_v35  ;;  %v88_v53 = vld [vmem:[#allocation6 + $0x138] sm:$0xff]  ;;  %v712_v55 = vcombine.low %v76_v43, %v80_v44  ;;  %v160_v20 = vcombine.high %v898_v47, %v898_v47 }
  0x39   :  { %v92_v60 = vld [vmem:[#allocation6 + $0x158] sm:$0xff]  ;;  %v720_v63 = vcombine.low %v84_v52, %v88_v53 }
  0x3a   :  { %v96_v61 = vld [vmem:[#allocation6 + $0x178] sm:$0xff] }
  0x3b   :  { %496 = vmatpush1.bf16.xpose.msra.mxu0 %v698_v36  ;;  %536 = vmatpush1.bf16.xpose.msra.mxu1 %v700_v37  ;;  %v68_v36 = vld [vmem:[#allocation6 + $0x98] sm:$0xff]  ;;  %v728_v7 = vcombine.low %v92_v60, %v96_v61 }
  0x3c   :  { %497 = vmatprep.subr.bf16.mxu0 %v707_v38  ;;  %537 = vmatprep.subr.bf16.mxu1 %v709_v41  ;;  %v72_v37 = vld [vmem:[#allocation6 + $0xb8] sm:$0xff]  ;;  %v694_v38 = vcombine.low %v59_v22, %v63_v24  ;;  %v75_v41 = vld [vmem:[#allocation6 + $0xd0] sm:$0xff] }
  0x3d   :  { %v705_v40 = vcombine.high %v68_v36, %v72_v37  ;;  %v704_v46 = vcombine.low %v68_v36, %v72_v37  ;;  %v710_v54 = vcombine.low %v75_v41, %v79_v42  ;;  %v100_v4 = vld [vmem:[#allocation6 + $0x198] sm:$0xff] }
  0x3e   :  { %v104_v5 = vld [vmem:[#allocation6 + $0x1b8] sm:$0xff] }
  0x3f   :  { %v108_v12 = vld [vmem:[#allocation6 + $0x1d8] sm:$0xff]  ;;  %v736_v15 = vcombine.low %v100_v4, %v104_v5 }
  0x40   :  { %v112_v13 = vld [vmem:[#allocation6 + $0x1f8] sm:$0xff] }
  0x43   :  { %498 = vmatpush1.bf16.xpose.msra.mxu0 %v706_v48  ;;  %538 = vmatpush1.bf16.xpose.msra.mxu1 %v708_v49  ;;  %v711_v48 = vcombine.high %v75_v41, %v79_v42  ;;  %v713_v49 = vcombine.high %v76_v43, %v80_v44  ;;  %v746_v42 = vld [vmem:[%s925_s2] ss:$0 sm:$0xff] }
  0x44   :  { %499 = vmatprep.subr.bf16.mxu0 %v715_v50  ;;  %539 = vmatprep.subr.bf16.mxu1 %v717_v51  ;;  %v83_v50 = vld [vmem:[#allocation6 + $0x110] sm:$0xff] }
  0x45   :  { %v87_v51 = vld [vmem:[#allocation6 + $0x130] sm:$0xff] }
  0x46   :  { %v718_v62 = vcombine.low %v83_v50, %v87_v51 }
  0x4b   :  { %500 = vmatpush1.bf16.xpose.msra.mxu0 %v714_v56  ;;  %540 = vmatpush1.bf16.xpose.msra.mxu1 %v716_v57  ;;  %v719_v56 = vcombine.high %v83_v50, %v87_v51  ;;  %v721_v57 = vcombine.high %v84_v52, %v88_v53 }
  0x4c   :  { %501 = vmatprep.subr.bf16.mxu0 %v723_v58  ;;  %541 = vmatprep.subr.bf16.mxu1 %v725_v59  ;;  %v91_v58 = vld [vmem:[#allocation6 + $0x150] sm:$0xff] }
  0x4d   :  { %v95_v59 = vld [vmem:[#allocation6 + $0x170] sm:$0xff] }
  0x4e   :  { %v726_v6 = vcombine.low %v91_v58, %v95_v59 }
  0x53   :  { %502 = vmatpush1.bf16.xpose.msra.mxu0 %v722_v0  ;;  %542 = vmatpush1.bf16.xpose.msra.mxu1 %v724_v1  ;;  %v727_v0 = vcombine.high %v91_v58, %v95_v59  ;;  %v729_v1 = vcombine.high %v92_v60, %v96_v61 }
  0x54   :  { %503 = vmatprep.subr.bf16.mxu0 %v731_v2  ;;  %543 = vmatprep.subr.bf16.mxu1 %v733_v3  ;;  %v99_v2 = vld [vmem:[#allocation6 + $0x190] sm:$0xff] }
  0x55   :  { %v103_v3 = vld [vmem:[#allocation6 + $0x1b0] sm:$0xff] }
  0x56   :  { %v734_v14 = vcombine.low %v99_v2, %v103_v3 }
  0x5b   :  { %504 = vmatpush1.bf16.xpose.msra.mxu0 %v730_v8  ;;  %544 = vmatpush1.bf16.xpose.msra.mxu1 %v732_v9  ;;  %v735_v8 = vcombine.high %v99_v2, %v103_v3  ;;  %v737_v9 = vcombine.high %v100_v4, %v104_v5 }
  0x5c   :  { %505 = vmatprep.subr.bf16.mxu0 %v739_v10  ;;  %545 = vmatprep.subr.bf16.mxu1 %v741_v11  ;;  %v107_v10 = vld [vmem:[#allocation6 + $0x1d0] sm:$0xff] }
  0x5d   :  { %v111_v11 = vld [vmem:[#allocation6 + $0x1f0] sm:$0xff] }
  0x63   :  { %506 = vmatpush1.bf16.xpose.msra.mxu0 %v738_v16  ;;  %546 = vmatpush1.bf16.xpose.msra.mxu1 %v740_v17  ;;  %v743_v16 = vcombine.high %v107_v10, %v111_v11  ;;  %v745_v17 = vcombine.high %v108_v12, %v112_v13 }
  0x64   :  { %571 = vmatprep.subr.bf16.mxu0 %v687_v18  ;;  %611 = vmatprep.subr.bf16.mxu1 %v689_v19  ;;  %v742_v18 = vcombine.low %v107_v10, %v111_v11  ;;  %v744_v19 = vcombine.low %v108_v12, %v112_v13 }
  0x6a   :  { %524 = vmatmul.mubr.bf16.vlgmr.msra.gmra.mrb[0].mxu0 %v137_v21  ;;  %564 = vmatmul.mubr.bf16.vlgmr.msra.gmra.mrb[0].mxu1 %v159_v28  ;;  %v832_v21 = vmov 0.0  }
  0x6b   :  { %572 = vmatpush1.bf16.xpose.msra.mxu0 %v686_v30  ;;  %612 = vmatpush1.bf16.xpose.msra.mxu1 %v688_v31  ;;  %46 = vst [vmem:[#allocation2] sm:$0x3] %v832_v21 }
  0x6c   :  { %573 = vmatprep.subr.bf16.mxu0 %v695_v32  ;;  %613 = vmatprep.subr.bf16.mxu1 %v697_v33 }
  0x6d   :  { %603 = vmatprep.mubr.bf16.mxu0 %v158_v27  ;;  %643 = vmatprep.mubr.bf16.mxu1 %v162_v34 }
  0x72   :  { %v47_v36 = vld [vmem:[#allocation2] sm:$0x3] }
  0x73   :  { %574 = vmatpush1.bf16.xpose.msra.mxu0 %v694_v38  ;;  %614 = vmatpush1.bf16.xpose.msra.mxu1 %v696_v23 }
  0x74   :  { %575 = vmatprep.subr.bf16.mxu0 %v703_v39  ;;  %615 = vmatprep.subr.bf16.mxu1 %v705_v40 }
  0x7b   :  { %576 = vmatpush1.bf16.xpose.msra.mxu0 %v702_v45  ;;  %616 = vmatpush1.bf16.xpose.msra.mxu1 %v704_v46 }
  0x7c   :  { %577 = vmatprep.subr.bf16.mxu0 %v711_v48  ;;  %617 = vmatprep.subr.bf16.mxu1 %v713_v49 }
  0x83   :  { %578 = vmatpush1.bf16.xpose.msra.mxu0 %v710_v54  ;;  %618 = vmatpush1.bf16.xpose.msra.mxu1 %v712_v55 }
  0x84   :  { %579 = vmatprep.subr.bf16.mxu0 %v719_v56  ;;  %619 = vmatprep.subr.bf16.mxu1 %v721_v57 }
  0x8b   :  { %580 = vmatpush1.bf16.xpose.msra.mxu0 %v718_v62  ;;  %620 = vmatpush1.bf16.xpose.msra.mxu1 %v720_v63 }
  0x8c   :  { %581 = vmatprep.subr.bf16.mxu0 %v727_v0  ;;  %621 = vmatprep.subr.bf16.mxu1 %v729_v1 }
  0x93   :  { %582 = vmatpush1.bf16.xpose.msra.mxu0 %v726_v6  ;;  %622 = vmatpush1.bf16.xpose.msra.mxu1 %v728_v7 }
  0x94   :  { %583 = vmatprep.subr.bf16.mxu0 %v735_v8  ;;  %623 = vmatprep.subr.bf16.mxu1 %v737_v9 }
  0x9b   :  { %584 = vmatpush1.bf16.xpose.msra.mxu0 %v734_v14  ;;  %624 = vmatpush1.bf16.xpose.msra.mxu1 %v736_v15 }
  0x9c   :  { %585 = vmatprep.subr.bf16.mxu0 %v743_v16  ;;  %625 = vmatprep.subr.bf16.mxu1 %v745_v17 }
  0xa3   :  { %586 = vmatpush1.bf16.xpose.msra.mxu0 %v742_v18  ;;  %626 = vmatpush1.bf16.xpose.msra.mxu1 %v744_v19 }
  0xaa   :  { %604 = vmatmul.mubr.bf16.vlgmr.msra.gmra.mrb[4].mxu0 %v898_v47  ;;  %644 = vmatmul.mubr.bf16.vlgmr.msra.gmra.mrb[4].mxu1 %v160_v20 }
 0x13d   :  { %v525_v22 = vpop.f32.mrb[0].mxu0  ;;  %v565_v24 = vpop.f32.mrb[0].mxu1 }
 0x13e   :  { %v527_v25 = vpop.f32.mrb[1].mxu0  ;;  %v566_v26 = vadd.f32 %v565_v24, %v525_v22  ;;  %v567_v27 = vpop.f32.mrb[1].mxu1 }
 0x13f   :  { %v528_v28 = vpop.f32.mrb[2].mxu0  ;;  %v568_v30 = vpop.f32.mrb[2].mxu1 }
 0x140   :  { %v529_v31 = vpop.f32.mrb[3].mxu0  ;;  %v569_v32 = vpop.f32.mrb[3].mxu1 }
 0x17d   :  { %v605_v33 = vpop.f32.mrb[4].mxu0  ;;  %v645_v29 = vpop.f32.mrb[4].mxu1 }
 0x17e   :  { %v606_v34 = vadd.f32 %v605_v33, %v566_v26  ;;  %v607_v35 = vpop.f32.mrb[5].mxu0  ;;  %v647_v37 = vpop.f32.mrb[5].mxu1 }
 0x17f   :  { %v608_v38 = vpop.f32.mrb[6].mxu0  ;;  %v648_v23 = vpop.f32.mrb[6].mxu1 }
 0x180   :  { %v646_v47 = vadd.f32 %v645_v29, %v606_v34  ;;  %v609_v39 = vpop.f32.mrb[7].mxu0  ;;  %v649_v40 = vpop.f32.mrb[7].mxu1 }
 0x182   :  { %v651_v41 = vadd.f32 %v646_v47, %v47_v36 }
 0x184   :  { %652 = vst [vmem:[#allocation2] sm:$0x3] %v651_v41 }
 0x18b   :  { %v656_v43 = vld [vmem:[#allocation2] sm:$0x3] }
 0x18c   :  { %v664_v44 = vadd.f32 %v746_v42, %v656_v43 }
 0x18e   :  { %665 = vst [vmem:[#allocation8] sm:$0x3] %v664_v44 }
 0x18f   :  { %810 = shalt.err (!%p807_p6)
}
 0x190   :  { %s811_s16 = scalar_lea.hbm %s926_s3, 32 }
 0x191   :  { %p812_p7 = scmp.ne.s32.totalorder %s926_s3, %s811_s16  ;;  %p815_p8 = scmp.lt.u32.totalorder %s811_s16, %s926_s3 }
 0x193   :  { %p817_p9 = pnand %p815_p8, %p812_p7 }
 0x195   :  { %820 = shalt.err (!%p817_p9)
}
 0x196   :  { %675 = dma.vmem_to_hbm [thread:$0]  %s673_s12, 32, %s926_s3, [#allocation5]  }
 0x197   :  { %825 = dma.done.wait [#allocation5], 32  }
 0x198   :  { %826 = vsyncadd [#allocation5], 4294967264 }
 0x199   :  { %679 = vsyncpa [#allocation4], 1 }
 0x19a   :  { %680 = vsyncpa [#allocation7], 1 }
 0x19b   :  { %681 = vsyncpa [#allocation5], 1 }

// kernel: tpu_custom_call.1
= control target key start
LH: loop header
LB: loop body
LE: loop exit
PB: predicated region body
PF: predicated region fallthrough
CT: control target
= control target key end

     0   :  { %8 = vsyncpa [#allocation4], 0  ;;  %s923_s0 = inlined_call_operand.hbm [shape: bf16[2,1024], index: 0, kind: input, shape index: {}]   ;;  %s924_s1 = inlined_call_operand.hbm [shape: bf16[128,1024], index: 1, kind: input, shape index: {}]   ;;  %s925_s2 = inlined_call_operand.vmem [shape: f32[1,128], index: 2, kind: input, shape index: {}]   ;;  %s926_s3 = inlined_call_operand.hbm [shape: f32[2,128], index: 3, kind: output, shape index: {}]  }
   0x1   :  { %9 = vsyncpa [#allocation7], 0 }
   0x2   :  { %10 = vsyncpa [#allocation5], 0  ;;  %s827_s12 = smov [#allocation3]   ;;  %s828_s14 = smov [#allocation6]  }
   0x3   :  { %s17_s13 = sshll.u32 %s827_s12, 4  ;;  %s26_s15 = sshll.u32 %s828_s14, 4  ;;  %s18_s13 = int_to_ptr.vmem [resolvable:$true] %s17_s13  ;;  %s854_s15 = int_to_ptr.vmem [resolvable:$true] %s26_s15 }
   0x4   :  { %s755_s18 = scalar_lea.hbm %s923_s0, 128 }
   0x5   :  { %p756_p0 = scmp.ne.s32.totalorder %s923_s0, %s755_s18  ;;  %p759_p1 = scmp.lt.u32.totalorder %s755_s18, %s923_s0 }
   0x7   :  { %p761_p2 = pnand %p759_p1, %p756_p0 }
   0x9   :  { %764 = shalt.err (!%p761_p2)
}
   0xa   :  { %s765_s23 = scalar_lea.vmem %s18_s13, 128  ;;  %p770_p4 = scmp.lt.s32.totalorder %s18_s13, %s18_s13 }
   0xb   :  { %p766_p3 = scmp.ne.s32.totalorder %s18_s13, %s765_s23  ;;  %p771_p5 = scmp.lt.s32.totalorder %s765_s23, %s765_s23 }
   0xd   :  { %p772_p6 = por %p771_p5, %p770_p4 }
   0xf   :  { %p773_p7 = pnand %p772_p6, %p766_p3 }
  0x11   :  { %776 = shalt.err (!%p773_p7)
}
  0x12   :  { %20 = dma.hbm_to_vmem [thread:$0]  %s923_s0, 128, %s18_s13, [#allocation4]  }
  0x13   :  { %s777_s28 = scalar_lea.hbm %s924_s1, 8192 }
  0x14   :  { %p778_p8 = scmp.ne.s32.totalorder %s924_s1, %s777_s28  ;;  %p781_p9 = scmp.lt.u32.totalorder %s777_s28, %s924_s1 }
  0x16   :  { %p783_p10 = pnand %p781_p9, %p778_p8 }
  0x18   :  { %786 = shalt.err (!%p783_p10)
}
  0x19   :  { %s787_s6 = scalar_lea.vmem %s854_s15, 8192  ;;  %p792_p12 = scmp.lt.s32.totalorder %s854_s15, %s854_s15 }
  0x1a   :  { %p788_p11 = scmp.ne.s32.totalorder %s854_s15, %s787_s6  ;;  %p793_p13 = scmp.lt.s32.totalorder %s787_s6, %s787_s6 }
  0x1c   :  { %p794_p0 = por %p793_p13, %p792_p12 }
  0x1e   :  { %p795_p1 = pnand %p794_p0, %p788_p11 }
  0x20   :  { %798 = shalt.err (!%p795_p1)
}
  0x21   :  { %s829_s0 = smov 512   ;;  %s830_s7 = smov 32  }
  0x22   :  { %32 = dma.hbm_to_vmem [thread:$0]  %s924_s1, 8192, %s854_s15, [#allocation7], %s829_s0, %s829_s0, %s830_s7  }
  0x23   :  { %821 = dma.done.wait [#allocation4], 128  }
  0x24   :  { %822 = vsyncadd [#allocation4], 4294967168 }
  0x25   :  { %823 = dma.done.wait [#allocation7], 8192  }
  0x26   :  { %824 = vsyncadd [#allocation7], 4294959104  ;;  %v831_v0 = vmov 1966171168   ;;  %v118_v2 = vlaneseq  ;;  %v49_v3 = vld [vmem:[#allocation6] sm:$0xff]  ;;  %v50_v5 = vld [vmem:[#allocation6 + $0x8] sm:$0xff] }
  0x27   :  { %v116_v1 = vunpack.c.l.s4 %v831_v0  ;;  %v53_v4 = vld [vmem:[#allocation6 + $0x20] sm:$0xff]  ;;  %v54_v7 = vld [vmem:[#allocation6 + $0x28] sm:$0xff]  ;;  %v48_v28 = vld [vmem:[#allocation3] sm:$0xff]  ;;  %s833_s11 = smov [#allocation8]  }
  0x28   :  { %v683_v6 = vcombine.high %v49_v3, %v53_v4  ;;  %v682_v8 = vcombine.low %v49_v3, %v53_v4  ;;  %v57_v9 = vld [vmem:[#allocation6 + $0x40] sm:$0xff]  ;;  %v685_v11 = vcombine.high %v50_v5, %v54_v7  ;;  %v684_v12 = vcombine.low %v50_v5, %v54_v7  ;;  %v58_v14 = vld [vmem:[#allocation6 + $0x48] sm:$0xff]  ;;  %s672_s12 = sshll.u32 %s833_s11, 4  ;;  %s673_s12 = int_to_ptr.vmem [resolvable:$true] %s672_s12 }
  0x29   :  { %v61_v10 = vld [vmem:[#allocation6 + $0x60] sm:$0xff]  ;;  %v62_v15 = vld [vmem:[#allocation6 + $0x68] sm:$0xff]  ;;  %v117_v17 = vunpack.c.0.s8 %v116_v1  ;;  %v119_v18 = vshrl.u32 %v118_v2, 7  ;;  %v114_v39 = vcombine.high %v48_v28, %v48_v28  ;;  %s799_s13 = scalar_lea.vmem %s673_s12, 32  ;;  %p804_p3 = scmp.lt.s32.totalorder %s673_s12, %s673_s12 }
  0x2a   :  { %v691_v13 = vcombine.high %v57_v9, %v61_v10  ;;  %491 = vmatprep.subr.bf16.mxu0 %v683_v6  ;;  %v693_v16 = vcombine.high %v58_v14, %v62_v15  ;;  %531 = vmatprep.subr.bf16.mxu1 %v685_v11  ;;  %v65_v19 = vld [vmem:[#allocation6 + $0x80] sm:$0xff]  ;;  %v66_v21 = vld [vmem:[#allocation6 + $0x88] sm:$0xff]  ;;  %v690_v24 = vcombine.low %v57_v9, %v61_v10  ;;  %p800_p2 = scmp.ne.s32.totalorder %s673_s12, %s799_s13  ;;  %p805_p4 = scmp.lt.s32.totalorder %s799_s13, %s799_s13 }
  0x2b   :  { %492 = vmatpush1.bf16.xpose.msra.mxu0 %v682_v8  ;;  %532 = vmatpush1.bf16.xpose.msra.mxu1 %v684_v12  ;;  %v69_v20 = vld [vmem:[#allocation6 + $0xa0] sm:$0xff]  ;;  %v70_v22 = vld [vmem:[#allocation6 + $0xa8] sm:$0xff]  ;;  %v885_v23 = vsub.s32 %v117_v17, %v119_v18  ;;  %v692_v25 = vcombine.low %v58_v14, %v62_v15  ;;  %v51_v12 = vld [vmem:[#allocation6 + $0x10] sm:$0xff] }
  0x2c   :  { %493 = vmatprep.subr.bf16.mxu0 %v691_v13  ;;  %533 = vmatprep.subr.bf16.mxu1 %v693_v16  ;;  %v699_v26 = vcombine.high %v65_v19, %v69_v20  ;;  %v701_v27 = vcombine.high %v66_v21, %v70_v22  ;;  %v73_v31 = vld [vmem:[#allocation6 + $0xc0] sm:$0xff]  ;;  %v74_v33 = vld [vmem:[#allocation6 + $0xc8] sm:$0xff]  ;;  %v698_v36 = vcombine.low %v65_v19, %v69_v20  ;;  %v55_v13 = vld [vmem:[#allocation6 + $0x30] sm:$0xff]  ;;  %p806_p5 = por %p805_p4, %p804_p3 }
  0x2d   :  { %v888_v29 = vrot.slane %v48_v28, %v885_v23  ;;  %v77_v32 = vld [vmem:[#allocation6 + $0xe0] sm:$0xff]  ;;  %v78_v34 = vld [vmem:[#allocation6 + $0xe8] sm:$0xff]  ;;  %v700_v37 = vcombine.low %v66_v21, %v70_v22  ;;  %v894_v42 = vrot.slane %v114_v39, %v885_v23  ;;  %v52_v14 = vld [vmem:[#allocation6 + $0x18] sm:$0xff]  ;;  %v687_v18 = vcombine.high %v51_v12, %v55_v13 }
  0x2e   :  { %v707_v38 = vcombine.high %v73_v31, %v77_v32  ;;  %v709_v41 = vcombine.high %v74_v33, %v78_v34  ;;  %v81_v43 = vld [vmem:[#allocation6 + $0x100] sm:$0xff]  ;;  %v82_v45 = vld [vmem:[#allocation6 + $0x108] sm:$0xff]  ;;  %v706_v48 = vcombine.low %v73_v31, %v77_v32  ;;  %v708_v49 = vcombine.low %v74_v33, %v78_v34  ;;  %v56_v15 = vld [vmem:[#allocation6 + $0x38] sm:$0xff]  ;;  %p807_p6 = pnand %p806_p5, %p800_p2 }
  0x2f   :  { %v129_v30 = vcombine.high %v888_v29, %v888_v29  ;;  %v85_v44 = vld [vmem:[#allocation6 + $0x120] sm:$0xff]  ;;  %v86_v46 = vld [vmem:[#allocation6 + $0x128] sm:$0xff]  ;;  %v898_v47 = vrot.slane %v894_v42, %v885_v23  ;;  %v689_v19 = vcombine.high %v52_v14, %v56_v15  ;;  %v130_v20 = vcombine.high %v894_v42, %v894_v42  ;;  %v59_v22 = vld [vmem:[#allocation6 + $0x50] sm:$0xff] }
  0x30   :  { %v715_v50 = vcombine.high %v81_v43, %v85_v44  ;;  %v717_v51 = vcombine.high %v82_v45, %v86_v46  ;;  %v89_v52 = vld [vmem:[#allocation6 + $0x140] sm:$0xff]  ;;  %v90_v54 = vld [vmem:[#allocation6 + $0x148] sm:$0xff]  ;;  %v714_v56 = vcombine.low %v81_v43, %v85_v44  ;;  %v716_v57 = vcombine.low %v82_v45, %v86_v46  ;;  %v79_v42 = vld [vmem:[#allocation6 + $0xf0] sm:$0xff] }
  0x31   :  { %v151_v35 = vrot.slane %v129_v30, %v885_v23  ;;  %v93_v53 = vld [vmem:[#allocation6 + $0x160] sm:$0xff]  ;;  %v94_v55 = vld [vmem:[#allocation6 + $0x168] sm:$0xff]  ;;  %v137_v21 = vrot.slane %v888_v29, %v885_v23  ;;  %v686_v30 = vcombine.low %v51_v12, %v55_v13  ;;  %v688_v31 = vcombine.low %v52_v14, %v56_v15  ;;  %v67_v29 = vld [vmem:[#allocation6 + $0x90] sm:$0xff] }
  0x32   :  { %v723_v58 = vcombine.high %v89_v52, %v93_v53  ;;  %v725_v59 = vcombine.high %v90_v54, %v94_v55  ;;  %v97_v60 = vld [vmem:[#allocation6 + $0x180] sm:$0xff]  ;;  %v98_v62 = vld [vmem:[#allocation6 + $0x188] sm:$0xff]  ;;  %v722_v0 = vcombine.low %v89_v52, %v93_v53  ;;  %v724_v1 = vcombine.low %v90_v54, %v94_v55  ;;  %v76_v43 = vld [vmem:[#allocation6 + $0xd8] sm:$0xff] }
  0x33   :  { %494 = vmatpush1.bf16.xpose.msra.mxu0 %v690_v24  ;;  %534 = vmatpush1.bf16.xpose.msra.mxu1 %v692_v25  ;;  %v161_v40 = vcombine.high %v151_v35, %v151_v35  ;;  %v101_v61 = vld [vmem:[#allocation6 + $0x1a0] sm:$0xff]  ;;  %v102_v63 = vld [vmem:[#allocation6 + $0x1a8] sm:$0xff]  ;;  %v63_v24 = vld [vmem:[#allocation6 + $0x70] sm:$0xff]  ;;  %v159_v28 = vcombine.high %v137_v21, %v137_v21 }
  0x34   :  { %495 = vmatprep.subr.bf16.mxu0 %v699_v26  ;;  %535 = vmatprep.subr.bf16.mxu1 %v701_v27  ;;  %v731_v2 = vcombine.high %v97_v60, %v101_v61  ;;  %v733_v3 = vcombine.high %v98_v62, %v102_v63  ;;  %v105_v4 = vld [vmem:[#allocation6 + $0x1c0] sm:$0xff]  ;;  %v106_v6 = vld [vmem:[#allocation6 + $0x1c8] sm:$0xff]  ;;  %v730_v8 = vcombine.low %v97_v60, %v101_v61  ;;  %v60_v25 = vld [vmem:[#allocation6 + $0x58] sm:$0xff] }
  0x35   :  { %523 = vmatprep.mubr.bf16.mxu0 %v151_v35  ;;  %563 = vmatprep.mubr.bf16.mxu1 %v161_v40  ;;  %v109_v5 = vld [vmem:[#allocation6 + $0x1e0] sm:$0xff]  ;;  %v110_v7 = vld [vmem:[#allocation6 + $0x1e8] sm:$0xff]  ;;  %v732_v9 = vcombine.low %v98_v62, %v102_v63  ;;  %v64_v26 = vld [vmem:[#allocation6 + $0x78] sm:$0xff]  ;;  %v158_v27 = vrot.slane %v130_v20, %v885_v23  ;;  %v695_v32 = vcombine.high %v59_v22, %v63_v24 }
  0x36   :  { %v739_v10 = vcombine.high %v105_v4, %v109_v5  ;;  %v741_v11 = vcombine.high %v106_v6, %v110_v7  ;;  %v738_v16 = vcombine.low %v105_v4, %v109_v5  ;;  %v740_v17 = vcombine.low %v106_v6, %v110_v7  ;;  %v71_v35 = vld [vmem:[#allocation6 + $0xb0] sm:$0xff]  ;;  %v80_v44 = vld [vmem:[#allocation6 + $0xf8] sm:$0xff] }
  0x37   :  { %v697_v33 = vcombine.high %v60_v25, %v64_v26  ;;  %v162_v34 = vcombine.high %v158_v27, %v158_v27  ;;  %v696_v23 = vcombine.low %v60_v25, %v64_v26  ;;  %v703_v39 = vcombine.high %v67_v29, %v71_v35  ;;  %v84_v52 = vld [vmem:[#allocation6 + $0x118] sm:$0xff] }
  0x38   :  { %v702_v45 = vcombine.low %v67_v29, %v71_v35  ;;  %v88_v53 = vld [vmem:[#allocation6 + $0x138] sm:$0xff]  ;;  %v712_v55 = vcombine.low %v76_v43, %v80_v44  ;;  %v160_v20 = vcombine.high %v898_v47, %v898_v47 }
  0x39   :  { %v92_v60 = vld [vmem:[#allocation6 + $0x158] sm:$0xff]  ;;  %v720_v63 = vcombine.low %v84_v52, %v88_v53 }
  0x3a   :  { %v96_v61 = vld [vmem:[#allocation6 + $0x178] sm:$0xff] }
  0x3b   :  { %496 = vmatpush1.bf16.xpose.msra.mxu0 %v698_v36  ;;  %536 = vmatpush1.bf16.xpose.msra.mxu1 %v700_v37  ;;  %v68_v36 = vld [vmem:[#allocation6 + $0x98] sm:$0xff]  ;;  %v728_v7 = vcombine.low %v92_v60, %v96_v61 }
  0x3c   :  { %497 = vmatprep.subr.bf16.mxu0 %v707_v38  ;;  %537 = vmatprep.subr.bf16.mxu1 %v709_v41  ;;  %v72_v37 = vld [vmem:[#allocation6 + $0xb8] sm:$0xff]  ;;  %v694_v38 = vcombine.low %v59_v22, %v63_v24  ;;  %v75_v41 = vld [vmem:[#allocation6 + $0xd0] sm:$0xff] }
  0x3d   :  { %v705_v40 = vcombine.high %v68_v36, %v72_v37  ;;  %v704_v46 = vcombine.low %v68_v36, %v72_v37  ;;  %v710_v54 = vcombine.low %v75_v41, %v79_v42  ;;  %v100_v4 = vld [vmem:[#allocation6 + $0x198] sm:$0xff] }
  0x3e   :  { %v104_v5 = vld [vmem:[#allocation6 + $0x1b8] sm:$0xff] }
  0x3f   :  { %v108_v12 = vld [vmem:[#allocation6 + $0x1d8] sm:$0xff]  ;;  %v736_v15 = vcombine.low %v100_v4, %v104_v5 }
  0x40   :  { %v112_v13 = vld [vmem:[#allocation6 + $0x1f8] sm:$0xff] }
  0x43   :  { %498 = vmatpush1.bf16.xpose.msra.mxu0 %v706_v48  ;;  %538 = vmatpush1.bf16.xpose.msra.mxu1 %v708_v49  ;;  %v711_v48 = vcombine.high %v75_v41, %v79_v42  ;;  %v713_v49 = vcombine.high %v76_v43, %v80_v44  ;;  %v746_v42 = vld [vmem:[%s925_s2] ss:$0 sm:$0xff] }
  0x44   :  { %499 = vmatprep.subr.bf16.mxu0 %v715_v50  ;;  %539 = vmatprep.subr.bf16.mxu1 %v717_v51  ;;  %v83_v50 = vld [vmem:[#allocation6 + $0x110] sm:$0xff] }
  0x45   :  { %v87_v51 = vld [vmem:[#allocation6 + $0x130] sm:$0xff] }
  0x46   :  { %v718_v62 = vcombine.low %v83_v50, %v87_v51 }
  0x4b   :  { %500 = vmatpush1.bf16.xpose.msra.mxu0 %v714_v56  ;;  %540 = vmatpush1.bf16.xpose.msra.mxu1 %v716_v57  ;;  %v719_v56 = vcombine.high %v83_v50, %v87_v51  ;;  %v721_v57 = vcombine.high %v84_v52, %v88_v53 }
  0x4c   :  { %501 = vmatprep.subr.bf16.mxu0 %v723_v58  ;;  %541 = vmatprep.subr.bf16.mxu1 %v725_v59  ;;  %v91_v58 = vld [vmem:[#allocation6 + $0x150] sm:$0xff] }
  0x4d   :  { %v95_v59 = vld [vmem:[#allocation6 + $0x170] sm:$0xff] }
  0x4e   :  { %v726_v6 = vcombine.low %v91_v58, %v95_v59 }
  0x53   :  { %502 = vmatpush1.bf16.xpose.msra.mxu0 %v722_v0  ;;  %542 = vmatpush1.bf16.xpose.msra.mxu1 %v724_v1  ;;  %v727_v0 = vcombine.high %v91_v58, %v95_v59  ;;  %v729_v1 = vcombine.high %v92_v60, %v96_v61 }
  0x54   :  { %503 = vmatprep.subr.bf16.mxu0 %v731_v2  ;;  %543 = vmatprep.subr.bf16.mxu1 %v733_v3  ;;  %v99_v2 = vld [vmem:[#allocation6 + $0x190] sm:$0xff] }
  0x55   :  { %v103_v3 = vld [vmem:[#allocation6 + $0x1b0] sm:$0xff] }
  0x56   :  { %v734_v14 = vcombine.low %v99_v2, %v103_v3 }
  0x5b   :  { %504 = vmatpush1.bf16.xpose.msra.mxu0 %v730_v8  ;;  %544 = vmatpush1.bf16.xpose.msra.mxu1 %v732_v9  ;;  %v735_v8 = vcombine.high %v99_v2, %v103_v3  ;;  %v737_v9 = vcombine.high %v100_v4, %v104_v5 }
  0x5c   :  { %505 = vmatprep.subr.bf16.mxu0 %v739_v10  ;;  %545 = vmatprep.subr.bf16.mxu1 %v741_v11  ;;  %v107_v10 = vld [vmem:[#allocation6 + $0x1d0] sm:$0xff] }
  0x5d   :  { %v111_v11 = vld [vmem:[#allocation6 + $0x1f0] sm:$0xff] }
  0x63   :  { %506 = vmatpush1.bf16.xpose.msra.mxu0 %v738_v16  ;;  %546 = vmatpush1.bf16.xpose.msra.mxu1 %v740_v17  ;;  %v743_v16 = vcombine.high %v107_v10, %v111_v11  ;;  %v745_v17 = vcombine.high %v108_v12, %v112_v13 }
  0x64   :  { %571 = vmatprep.subr.bf16.mxu0 %v687_v18  ;;  %611 = vmatprep.subr.bf16.mxu1 %v689_v19  ;;  %v742_v18 = vcombine.low %v107_v10, %v111_v11  ;;  %v744_v19 = vcombine.low %v108_v12, %v112_v13 }
  0x6a   :  { %524 = vmatmul.mubr.bf16.vlgmr.msra.gmra.mrb[0].mxu0 %v137_v21  ;;  %564 = vmatmul.mubr.bf16.vlgmr.msra.gmra.mrb[0].mxu1 %v159_v28  ;;  %v832_v21 = vmov 0.0  }
  0x6b   :  { %572 = vmatpush1.bf16.xpose.msra.mxu0 %v686_v30  ;;  %612 = vmatpush1.bf16.xpose.msra.mxu1 %v688_v31  ;;  %46 = vst [vmem:[#allocation2] sm:$0x3] %v832_v21 }
  0x6c   :  { %573 = vmatprep.subr.bf16.mxu0 %v695_v32  ;;  %613 = vmatprep.subr.bf16.mxu1 %v697_v33 }
  0x6d   :  { %603 = vmatprep.mubr.bf16.mxu0 %v158_v27  ;;  %643 = vmatprep.mubr.bf16.mxu1 %v162_v34 }
  0x72   :  { %v47_v36 = vld [vmem:[#allocation2] sm:$0x3] }
  0x73   :  { %574 = vmatpush1.bf16.xpose.msra.mxu0 %v694_v38  ;;  %614 = vmatpush1.bf16.xpose.msra.mxu1 %v696_v23 }
  0x74   :  { %575 = vmatprep.subr.bf16.mxu0 %v703_v39  ;;  %615 = vmatprep.subr.bf16.mxu1 %v705_v40 }
  0x7b   :  { %576 = vmatpush1.bf16.xpose.msra.mxu0 %v702_v45  ;;  %616 = vmatpush1.bf16.xpose.msra.mxu1 %v704_v46 }
  0x7c   :  { %577 = vmatprep.subr.bf16.mxu0 %v711_v48  ;;  %617 = vmatprep.subr.bf16.mxu1 %v713_v49 }
  0x83   :  { %578 = vmatpush1.bf16.xpose.msra.mxu0 %v710_v54  ;;  %618 = vmatpush1.bf16.xpose.msra.mxu1 %v712_v55 }
  0x84   :  { %579 = vmatprep.subr.bf16.mxu0 %v719_v56  ;;  %619 = vmatprep.subr.bf16.mxu1 %v721_v57 }
  0x8b   :  { %580 = vmatpush1.bf16.xpose.msra.mxu0 %v718_v62  ;;  %620 = vmatpush1.bf16.xpose.msra.mxu1 %v720_v63 }
  0x8c   :  { %581 = vmatprep.subr.bf16.mxu0 %v727_v0  ;;  %621 = vmatprep.subr.bf16.mxu1 %v729_v1 }
  0x93   :  { %582 = vmatpush1.bf16.xpose.msra.mxu0 %v726_v6  ;;  %622 = vmatpush1.bf16.xpose.msra.mxu1 %v728_v7 }
  0x94   :  { %583 = vmatprep.subr.bf16.mxu0 %v735_v8  ;;  %623 = vmatprep.subr.bf16.mxu1 %v737_v9 }
  0x9b   :  { %584 = vmatpush1.bf16.xpose.msra.mxu0 %v734_v14  ;;  %624 = vmatpush1.bf16.xpose.msra.mxu1 %v736_v15 }
  0x9c   :  { %585 = vmatprep.subr.bf16.mxu0 %v743_v16  ;;  %625 = vmatprep.subr.bf16.mxu1 %v745_v17 }
  0xa3   :  { %586 = vmatpush1.bf16.xpose.msra.mxu0 %v742_v18  ;;  %626 = vmatpush1.bf16.xpose.msra.mxu1 %v744_v19 }
  0xaa   :  { %604 = vmatmul.mubr.bf16.vlgmr.msra.gmra.mrb[4].mxu0 %v898_v47  ;;  %644 = vmatmul.mubr.bf16.vlgmr.msra.gmra.mrb[4].mxu1 %v160_v20 }
 0x13d   :  { %v525_v22 = vpop.f32.mrb[0].mxu0  ;;  %v565_v24 = vpop.f32.mrb[0].mxu1 }
 0x13e   :  { %v527_v25 = vpop.f32.mrb[1].mxu0  ;;  %v566_v26 = vadd.f32 %v565_v24, %v525_v22  ;;  %v567_v27 = vpop.f32.mrb[1].mxu1 }
 0x13f   :  { %v528_v28 = vpop.f32.mrb[2].mxu0  ;;  %v568_v30 = vpop.f32.mrb[2].mxu1 }
 0x140   :  { %v529_v31 = vpop.f32.mrb[3].mxu0  ;;  %v569_v32 = vpop.f32.mrb[3].mxu1 }
 0x17d   :  { %v605_v33 = vpop.f32.mrb[4].mxu0  ;;  %v645_v29 = vpop.f32.mrb[4].mxu1 }
 0x17e   :  { %v606_v34 = vadd.f32 %v605_v33, %v566_v26  ;;  %v607_v35 = vpop.f32.mrb[5].mxu0  ;;  %v647_v37 = vpop.f32.mrb[5].mxu1 }
 0x17f   :  { %v608_v38 = vpop.f32.mrb[6].mxu0  ;;  %v648_v23 = vpop.f32.mrb[6].mxu1 }
 0x180   :  { %v646_v47 = vadd.f32 %v645_v29, %v606_v34  ;;  %v609_v39 = vpop.f32.mrb[7].mxu0  ;;  %v649_v40 = vpop.f32.mrb[7].mxu1 }
 0x182   :  { %v651_v41 = vadd.f32 %v646_v47, %v47_v36 }
 0x184   :  { %652 = vst [vmem:[#allocation2] sm:$0x3] %v651_v41 }
 0x18b   :  { %v656_v43 = vld [vmem:[#allocation2] sm:$0x3] }
 0x18c   :  { %v664_v44 = vadd.f32 %v746_v42, %v656_v43 }
 0x18e   :  { %665 = vst [vmem:[#allocation8] sm:$0x3] %v664_v44 }
 0x18f   :  { %810 = shalt.err (!%p807_p6)
}
 0x190   :  { %s811_s16 = scalar_lea.hbm %s926_s3, 32 }
 0x191   :  { %p812_p7 = scmp.ne.s32.totalorder %s926_s3, %s811_s16  ;;  %p815_p8 = scmp.lt.u32.totalorder %s811_s16, %s926_s3 }
 0x193   :  { %p817_p9 = pnand %p815_p8, %p812_p7 }
 0x195   :  { %820 = shalt.err (!%p817_p9)
}
 0x196   :  { %675 = dma.vmem_to_hbm [thread:$0]  %s673_s12, 32, %s926_s3, [#allocation5]  }
 0x197   :  { %825 = dma.done.wait [#allocation5], 32  }
 0x198   :  { %826 = vsyncadd [#allocation5], 4294967264 }
 0x199   :  { %679 = vsyncpa [#allocation4], 1 }
 0x19a   :  { %680 = vsyncpa [#allocation7], 1 }
 0x19b   :  { %681 = vsyncpa [#allocation5], 1 }

</bundles_post_ra>
